<compile_context>
chip_gen: v6e
topology: v6e:2x2x1
jax: 0.10.0
libtpu: 0.0.40
codegen_flags: <defaults>
</compile_context>

<pallas_src>
import functools

import jax
import jax.numpy as jnp
from jax import lax
from jax.experimental import pallas as pl
from jax.experimental.pallas import tpu as pltpu


def _round_up(a: int, b: int) -> int:
    return (a + b - 1) // b * b


def concat_linear_v2_kernel(x_ref, w_ref, b_ref, t_ref, hw_ref, o_ref, acc_ref):
    # x_ref : (tm, tk)   input tile
    # w_ref : (tn, tk)   weight tile, native nn.Linear (dim_out, dim_in) layout
    # b_ref : (1, tn)    bias tile (f32)
    # t_ref : (tm, 1)    per-row scalar t (f32)
    # hw_ref: (1, tn)    hyper-bias weight tile, Wh.T layout (f32)
    # o_ref : (tm, tn)   output tile
    # acc_ref: (tm, tn)  f32 accumulator scratch (persists across K steps)
    k = pl.program_id(2)

    @pl.when(k == 0)
    def _():
        acc_ref[...] = jnp.zeros_like(acc_ref)

    # Pure MXU accumulate in the inner loop: (tm,tk) x (tn,tk) contracted on tk.
    acc_ref[...] += lax.dot_general(
        x_ref[...], w_ref[...],
        dimension_numbers=(((1,), (1,)), ((), ())),
        preferred_element_type=jnp.float32,
    )

    # Epilogue only on the last K step: bias + hyper-bias + cast, single store.
    @pl.when(k == pl.num_programs(2) - 1)
    def _():
        y = acc_ref[...] + b_ref[...] + t_ref[...] * hw_ref[...]
        o_ref[...] = y.astype(o_ref.dtype)


@functools.partial(jax.jit, static_argnames=("tm", "tn", "tk"))
def concat_linear_v2(t, x, weight, bias, hyper_weight, *, tm=None, tn=None, tk=None):
    """t: [B] or [B,1]; x: [B, dim_in]; weight: [dim_out, dim_in];
    bias: [dim_out]; hyper_weight: [dim_out, 1] -> returns [B, dim_out]."""
    B, dim_in = x.shape
    dim_out = weight.shape[0]
    out_dtype = x.dtype

    # Tile sizes: lane-dense (multiples of 128 on N/K), sized well under the
    # 32 MiB default scoped-VMEM budget even on v7x (64 MiB physical).
    if tm is None:
        tm = min(256, _round_up(B, 8))
    if tn is None:
        tn = min(512, _round_up(dim_out, 128))
    if tk is None:
        tk = min(512, _round_up(dim_in, 128))

    Bp = _round_up(B, tm)
    Np = _round_up(dim_out, tn)
    Kp = _round_up(dim_in, tk)

    # Zero-pad to tile multiples (exact: K padding contributes 0 to the sum;
    # padded rows/cols of the output are sliced off at the end).
    x_p = x if (Bp == B and Kp == dim_in) else jnp.pad(
        x, ((0, Bp - B), (0, Kp - dim_in)))
    w_p = weight if (Np == dim_out and Kp == dim_in) else jnp.pad(
        weight, ((0, Np - dim_out), (0, Kp - dim_in)))
    b_p = jnp.pad(bias.astype(jnp.float32), (0, Np - dim_out)).reshape(1, Np)
    hw_p = jnp.pad(hyper_weight[:, 0].astype(jnp.float32),
                   (0, Np - dim_out)).reshape(1, Np)
    t_p = jnp.pad(jnp.reshape(t, (-1,)).astype(jnp.float32),
                  (0, Bp - B)).reshape(Bp, 1)

    grid = (Bp // tm, Np // tn, Kp // tk)

    cost = pl.CostEstimate(
        flops=2 * B * dim_in * dim_out,
        transcendentals=0,
        bytes_accessed=(x_p.size * x_p.dtype.itemsize
                        + w_p.size * w_p.dtype.itemsize
                        + Bp * Np * jnp.dtype(out_dtype).itemsize),
    )

    out = pl.pallas_call(
        concat_linear_v2_kernel,
        out_shape=jax.ShapeDtypeStruct((Bp, Np), out_dtype),
        grid=grid,
        in_specs=[
            pl.BlockSpec((tm, tk), lambda i, j, k: (i, k)),   # x
            pl.BlockSpec((tn, tk), lambda i, j, k: (j, k)),   # weight (native layout)
            pl.BlockSpec((1, tn), lambda i, j, k: (0, j)),    # bias
            pl.BlockSpec((tm, 1), lambda i, j, k: (i, 0)),    # t
            pl.BlockSpec((1, tn), lambda i, j, k: (0, j)),    # hyper-bias weight
        ],
        out_specs=pl.BlockSpec((tm, tn), lambda i, j, k: (i, j)),
        scratch_shapes=[pltpu.VMEM((tm, tn), jnp.float32)],
        compiler_params=pltpu.CompilerParams(
            dimension_semantics=("parallel", "parallel", "arbitrary")),
        cost_estimate=cost,
    )(x_p, w_p, b_p, t_p, hw_p)

    return out[:B, :dim_out]


if __name__ == "__main__":
    # Small shapes consistent with the module: B=8, dim_in=32, dim_out=32.
    B, dim_in, dim_out = 8, 32, 32
    key = jax.random.PRNGKey(0)
    k_t, k_x, k_w, k_b, k_h = jax.random.split(key, 5)

    # Deterministic parameter init mimicking PyTorch's uniform(-1/sqrt(fan_in), ...)
    kmain = 1.0 / (dim_in ** 0.5)
    khyp = 1.0  # fan_in = 1 for the hyper-bias linear
    weight = jax.random.uniform(k_w, (dim_out, dim_in), jnp.float32, -kmain, kmain)
    bias = jax.random.uniform(k_b, (dim_out,), jnp.float32, -kmain, kmain)
    hyper_weight = jax.random.uniform(k_h, (dim_out, 1), jnp.float32, -khyp, khyp)

    t = jax.random.normal(k_t, (B,), jnp.float32)
    x = jax.random.normal(k_x, (B, dim_in), jnp.float32)

    y = concat_linear_v2(t, x, weight, bias, hyper_weight)
    y = jax.block_until_ready(y)

    # Pure-JAX reference check (same math as the PyTorch module).
    y_ref = x @ weight.T + bias[None, :] + t[:, None] @ hyper_weight.T
    assert y.shape == (B, dim_out)
    assert jnp.allclose(y, y_ref, atol=1e-5, rtol=1e-5)

    print("KERNEL_OK")
</pallas_src>

<mosaic_0001>
module attributes {stable_mosaic.version = 11 : i64} {
  func.func @concat_linear_v2_kernel(%arg0: i32, %arg1: i32, %arg2: i32, %arg3: memref<8x128xf32, #tpu.memory_space<vmem>>, %arg4: memref<128x128xf32, #tpu.memory_space<vmem>>, %arg5: memref<1x128xf32, #tpu.memory_space<vmem>>, %arg6: memref<8x1xf32, #tpu.memory_space<vmem>>, %arg7: memref<1x128xf32, #tpu.memory_space<vmem>>, %arg8: memref<8x128xf32, #tpu.memory_space<vmem>>, %arg9: memref<8x128xf32, #tpu.memory_space<vmem>>) attributes {dimension_semantics = [#tpu.dimension_semantics<parallel>, #tpu.dimension_semantics<parallel>, #tpu.dimension_semantics<arbitrary>], iteration_bounds = array<i64: 1, 1, 1>, scalar_prefetch = 0 : i64, scratch_operands = 1 : i64, tpu.core_type = #tpu.core_type<tc>, window_params = [{transform_indices = @transform_0, window_bounds = array<i64: 8, 128>}, {transform_indices = @transform_1, window_bounds = array<i64: 128, 128>}, {transform_indices = @transform_2, window_bounds = array<i64: 1, 128>}, {transform_indices = @transform_3, window_bounds = array<i64: 8, 1>}, {transform_indices = @transform_4, window_bounds = array<i64: 1, 128>}, {transform_indices = @transform_5, window_bounds = array<i64: 8, 128>}]} {
    %c0_i32 = arith.constant 0 : i32
    %0 = arith.cmpi eq, %arg2, %c0_i32 : i32
    %1 = arith.extui %0 : i1 to i32
    %c0_i32_0 = arith.constant 0 : i32
    %2 = arith.cmpi ne, %1, %c0_i32_0 : i32
    scf.if %2 {
      %cst_10 = arith.constant 0.000000e+00 : f32
      %12 = vector.broadcast %cst_10 : f32 to vector<8x128xf32>
      %c0_11 = arith.constant 0 : index
      %c0_12 = arith.constant 0 : index
      %13 = vector.load %arg9[%c0_11, %c0_12] : memref<8x128xf32, #tpu.memory_space<vmem>>, vector<8x128xf32>
      tpu.vector_store %arg9[%c0_11, %c0_12], %12 {strides = array<i32>} : memref<8x128xf32, #tpu.memory_space<vmem>>, vector<8x128xf32>,
    } else {
    }
    %c0 = arith.constant 0 : index
    %c0_1 = arith.constant 0 : index
    %3 = vector.load %arg9[%c0, %c0_1] : memref<8x128xf32, #tpu.memory_space<vmem>>, vector<8x128xf32>
    %c0_2 = arith.constant 0 : index
    %c0_3 = arith.constant 0 : index
    %4 = vector.load %arg3[%c0_2, %c0_3] : memref<8x128xf32, #tpu.memory_space<vmem>>, vector<8x128xf32>
    %c0_4 = arith.constant 0 : index
    %c0_5 = arith.constant 0 : index
    %5 = vector.load %arg4[%c0_4, %c0_5] : memref<128x128xf32, #tpu.memory_space<vmem>>, vector<128x128xf32>
    %cst = arith.constant dense<0.000000e+00> : vector<8x128xf32>
    %6 = tpu.matmul %4, %5, %cst {dimension_numbers = #tpu.dot_dimension_numbers<[1], [1], [0], [0], [0, 0, 1, 0], [], []>} : vector<8x128xf32>, vector<128x128xf32>, vector<8x128xf32> -> vector<8x128xf32>
    %7 = arith.addf %3, %6 : vector<8x128xf32>
    %c0_6 = arith.constant 0 : index
    %c0_7 = arith.constant 0 : index
    %8 = vector.load %arg9[%c0_6, %c0_7] : memref<8x128xf32, #tpu.memory_space<vmem>>, vector<8x128xf32>
    tpu.vector_store %arg9[%c0_6, %c0_7], %7 {strides = array<i32>} : memref<8x128xf32, #tpu.memory_space<vmem>>, vector<8x128xf32>,
    %c0_i32_8 = arith.constant 0 : i32
    %9 = arith.cmpi eq, %arg2, %c0_i32_8 : i32
    %10 = arith.extui %9 : i1 to i32
    %c0_i32_9 = arith.constant 0 : i32
    %11 = arith.cmpi ne, %10, %c0_i32_9 : i32
    scf.if %11 {
      %c0_10 = arith.constant 0 : index
      %c0_11 = arith.constant 0 : index
      %12 = vector.load %arg9[%c0_10, %c0_11] : memref<8x128xf32, #tpu.memory_space<vmem>>, vector<8x128xf32>
      %c0_12 = arith.constant 0 : index
      %c0_13 = arith.constant 0 : index
      %13 = vector.load %arg5[%c0_12, %c0_13] : memref<1x128xf32, #tpu.memory_space<vmem>>, vector<1x128xf32>
      %14 = vector.broadcast %13 : vector<1x128xf32> to vector<8x128xf32>
      %15 = arith.addf %12, %14 : vector<8x128xf32>
      %c0_14 = arith.constant 0 : index
      %c0_15 = arith.constant 0 : index
      %16 = vector.load %arg6[%c0_14, %c0_15] : memref<8x1xf32, #tpu.memory_space<vmem>>, vector<8x1xf32>
      %c0_16 = arith.constant 0 : index
      %c0_17 = arith.constant 0 : index
      %17 = vector.load %arg7[%c0_16, %c0_17] : memref<1x128xf32, #tpu.memory_space<vmem>>, vector<1x128xf32>
      %18 = vector.broadcast %16 : vector<8x1xf32> to vector<8x128xf32>
      %19 = vector.broadcast %17 : vector<1x128xf32> to vector<8x128xf32>
      %20 = arith.mulf %18, %19 : vector<8x128xf32>
      %21 = arith.addf %15, %20 : vector<8x128xf32>
      %c0_18 = arith.constant 0 : index
      %c0_19 = arith.constant 0 : index
      %22 = vector.load %arg8[%c0_18, %c0_19] : memref<8x128xf32, #tpu.memory_space<vmem>>, vector<8x128xf32>
      tpu.vector_store %arg8[%c0_18, %c0_19], %21 {strides = array<i32>} : memref<8x128xf32, #tpu.memory_space<vmem>>, vector<8x128xf32>,
    } else {
    }
    return
  }
  func.func @transform_0(%arg0: i32, %arg1: i32, %arg2: i32) -> (i32, i32) {
    %c0_i32 = arith.constant 0 : i32
    return %arg0, %arg2 : i32, i32
  }
  func.func @transform_1(%arg0: i32, %arg1: i32, %arg2: i32) -> (i32, i32) {
    %c0_i32 = arith.constant 0 : i32
    return %arg1, %arg2 : i32, i32
  }
  func.func @transform_2(%arg0: i32, %arg1: i32, %arg2: i32) -> (i32, i32) {
    %c0_i32 = arith.constant 0 : i32
    %c0_i32_0 = arith.constant 0 : i32
    return %c0_i32, %arg1 : i32, i32
  }
  func.func @transform_3(%arg0: i32, %arg1: i32, %arg2: i32) -> (i32, i32) {
    %c0_i32 = arith.constant 0 : i32
    %c0_i32_0 = arith.constant 0 : i32
    return %arg0, %c0_i32 : i32, i32
  }
  func.func @transform_4(%arg0: i32, %arg1: i32, %arg2: i32) -> (i32, i32) {
    %c0_i32 = arith.constant 0 : i32
    %c0_i32_0 = arith.constant 0 : i32
    return %c0_i32, %arg1 : i32, i32
  }
  func.func @transform_5(%arg0: i32, %arg1: i32, %arg2: i32) -> (i32, i32) {
    %c0_i32 = arith.constant 0 : i32
    return %arg0, %arg1 : i32, i32
  }
}

</mosaic_0001>

<bundles_post_ra>
// kernel: concat_linear_v2.1
= control target key start
LH: loop header
LB: loop body
LE: loop exit
PB: predicated region body
PF: predicated region fallthrough
CT: control target
= control target key end

     0   :  { %v239_v1 = vmov 0.0   ;;  %vm240_vm0 = vmmov 0   ;;  %v241_v2 = vmov 0   ;;  %s336_s0 = inlined_call_operand.vmem [shape: f32[8,128], index: 0, kind: input, shape index: {}]   ;;  %s337_s1 = inlined_call_operand.vmem [shape: f32[128,128], index: 1, kind: input, shape index: {}]   ;;  %s338_s2 = inlined_call_operand.vmem [shape: f32[1,128], index: 2, kind: input, shape index: {}]   ;;  %s339_s3 = inlined_call_operand.vmem [shape: f32[8,1], index: 3, kind: input, shape index: {}]   ;;  %s340_s4 = inlined_call_operand.vmem [shape: f32[1,128], index: 4, kind: input, shape index: {}]   ;;  %s341_s5 = inlined_call_operand.hbm [shape: f32[8,128], index: 5, kind: output, shape index: {}]  }
   0x1   :  { %v43_v0 = vld [vmem:[%s337_s1 + $0x78] sm:$0xff]  ;;  %177 = vmatprep.subr.mxu0 %v239_v1  ;;  %209 = vmatprep.mubr.msk.f32.mxu0 %vm240_vm0, %v239_v1  ;;  %v42_v3 = vld [vmem:[%s337_s1 + $0x70] sm:$0xff]  ;;  %v128_v4 = vld [vmem:[%s339_s3] sm:$0xff] }
   0x2   :  { %178 = vmatpush3.xpose.msra.mxu0 %v43_v0  ;;  %216 = vset.pattern.permute.xlu0 %v241_v2 }
   0x3   :  { %179 = vmatprep.subr.mxu0 %v239_v1  ;;  %132 = vperm.xlu0 %216, %v128_v4  }
   0x6   :  { %180 = vmatpush3.xpose.msra.mxu0 %v42_v3 }
   0x7   :  { %10 = vsyncpa [#allocation4], 0  ;;  %181 = vmatprep.subr.mxu0 %v239_v1  ;;  %v41_v5 = vld [vmem:[%s337_s1 + $0x68] sm:$0xff]  ;;  %v40_v6 = vld [vmem:[%s337_s1 + $0x60] sm:$0xff]  ;;  %s242_s6 = smov [#allocation3]  }
   0x8   :  { %v39_v7 = vld [vmem:[%s337_s1 + $0x58] sm:$0xff]  ;;  %v38_v8 = vld [vmem:[%s337_s1 + $0x50] sm:$0xff]  ;;  %v37_v9 = vld [vmem:[%s337_s1 + $0x48] sm:$0xff]  ;;  %s150_s7 = sshll.u32 %s242_s6, 4  ;;  %s151_s7 = int_to_ptr.vmem [resolvable:$true] %s150_s7 }
   0x9   :  { %v36_v10 = vld [vmem:[%s337_s1 + $0x40] sm:$0xff]  ;;  %v35_v11 = vld [vmem:[%s337_s1 + $0x38] sm:$0xff]  ;;  %v34_v12 = vld [vmem:[%s337_s1 + $0x30] sm:$0xff]  ;;  %p222_p1 = scmp.lt.s32.totalorder %s151_s7, %s151_s7 }
   0xa   :  { %182 = vmatpush3.xpose.msra.mxu0 %v41_v5  ;;  %v33_v13 = vld [vmem:[%s337_s1 + $0x28] sm:$0xff]  ;;  %v32_v14 = vld [vmem:[%s337_s1 + $0x20] sm:$0xff]  ;;  %v31_v15 = vld [vmem:[%s337_s1 + $0x18] sm:$0xff] }
   0xb   :  { %183 = vmatprep.subr.mxu0 %v239_v1  ;;  %v30_v16 = vld [vmem:[%s337_s1 + $0x10] sm:$0xff]  ;;  %v29_v17 = vld [vmem:[%s337_s1 + $0x8] sm:$0xff]  ;;  %v28_v18 = vld [vmem:[%s337_s1] sm:$0xff] }
   0xc   :  { %v27_v19 = vld [vmem:[%s336_s0] sm:$0xff]  ;;  %s217_s0 = scalar_lea.vmem %s151_s7, 128 }
   0xd   :  { %v159_v20 = vld [vmem:[%s340_s4] ss:$0 sm:$0xff]  ;;  %p218_p0 = scmp.ne.s32.totalorder %s151_s7, %s217_s0  ;;  %p223_p2 = scmp.lt.s32.totalorder %s217_s0, %s217_s0 }
   0xe   :  { %184 = vmatpush3.xpose.msra.mxu0 %v40_v6  ;;  %v158_v22 = vld [vmem:[%s338_s2] ss:$0 sm:$0xff] }
   0xf   :  { %185 = vmatprep.subr.mxu0 %v239_v1  ;;  %p224_p3 = por %p223_p2, %p222_p1 }
  0x11   :  { %p225_p4 = pnand %p224_p3, %p218_p0 }
  0x12   :  { %186 = vmatpush3.xpose.msra.mxu0 %v39_v7 }
  0x13   :  { %187 = vmatprep.subr.mxu0 %v239_v1 }
  0x16   :  { %188 = vmatpush3.xpose.msra.mxu0 %v38_v8 }
  0x17   :  { %189 = vmatprep.subr.mxu0 %v239_v1 }
  0x1a   :  { %190 = vmatpush3.xpose.msra.mxu0 %v37_v9 }
  0x1b   :  { %191 = vmatprep.subr.mxu0 %v239_v1 }
  0x1e   :  { %192 = vmatpush3.xpose.msra.mxu0 %v36_v10 }
  0x1f   :  { %193 = vmatprep.subr.mxu0 %v239_v1 }
  0x22   :  { %194 = vmatpush3.xpose.msra.mxu0 %v35_v11 }
  0x23   :  { %195 = vmatprep.subr.mxu0 %v239_v1 }
  0x26   :  { %196 = vmatpush3.xpose.msra.mxu0 %v34_v12 }
  0x27   :  { %197 = vmatprep.subr.mxu0 %v239_v1 }
  0x2a   :  { %198 = vmatpush3.xpose.msra.mxu0 %v33_v13 }
  0x2b   :  { %199 = vmatprep.subr.mxu0 %v239_v1 }
  0x2e   :  { %200 = vmatpush3.xpose.msra.mxu0 %v32_v14 }
  0x2f   :  { %201 = vmatprep.subr.mxu0 %v239_v1 }
  0x32   :  { %202 = vmatpush3.xpose.msra.mxu0 %v31_v15 }
  0x33   :  { %203 = vmatprep.subr.mxu0 %v239_v1 }
  0x36   :  { %204 = vmatpush3.xpose.msra.mxu0 %v30_v16 }
  0x37   :  { %205 = vmatprep.subr.mxu0 %v239_v1 }
  0x3a   :  { %206 = vmatpush3.xpose.msra.mxu0 %v29_v17 }
  0x3b   :  { %207 = vmatprep.subr.mxu0 %v239_v1 }
  0x3e   :  { %208 = vmatpush3.xpose.msra.mxu0 %v28_v18 }
  0x41   :  { %210 = vmatmul.mubr.f32.vlgmr.msra.gmra.mxu0 %v27_v19 }
  0x7e   :  { %v133_v21 = vpop.permute.xlu0 %132 }
  0x7f   :  { %v141_v23 = vmul.f32 %v159_v20, %v133_v21 }
 0x101   :  { %v110_v24 = vpop.f32.mrf.mxu0 }
 0x102   :  { %v127_v25 = vadd.f32 %v158_v22, %v110_v24 }
 0x103   :  { %v211_v26 = vpop.f32.mrf.mxu0 }
 0x104   :  { %v142_v27 = vadd.f32 %v141_v23, %v127_v25 }
 0x106   :  { %143 = vst [vmem:[#allocation3] sm:$0xff] %v142_v27 }
 0x107   :  { %228 = shalt.err (!%p225_p4)
}
 0x108   :  { %153 = dma.vmem_to_hbm [thread:$0]  %s151_s7, 128, %s341_s5, [#allocation4]  }
 0x109   :  { %237 = dma.done.wait [#allocation4], 128  }
 0x10a   :  { %238 = vsyncadd [#allocation4], 4294967168 }
 0x10b   :  { %157 = vsyncpa [#allocation4], 1 }

</bundles_post_ra>
